<compile_context>
chip_gen: v5e
topology: v5e:2x2
jax: 0.10.0
libtpu: 0.0.40
codegen_flags: <defaults>
</compile_context>

<pallas_src>
import jax
import jax.numpy as jnp
import numpy as np
from jax.experimental import pallas as pl
from jax.experimental.pallas import tpu as pltpu


def _value_kernel(x_ref, w_ref, b_ref, o_ref):
    # (TB, D) * (1, D) --lane-reduce--> (TB, 1).  VPU + XLU only, no MXU.
    x = x_ref[...]                                    # (TB, D) f32
    w = w_ref[...]                                    # (1, D)  f32, lane-dense
    acc = jnp.sum(x * w, axis=-1, keepdims=True)      # (TB, 1) f32
    o_ref[...] = (acc + b_ref[0]).astype(o_ref.dtype)


def value_network(latent, weight_row, bias, *, block_b=None):
    """Forward pass of ValueNetwork.fc1.

    latent:     (B, D) f32
    weight_row: (1, D) f32  (PyTorch fc1.weight already has shape (out=1, in=D))
    bias:       (1,)   f32
    returns:    (B, 1) f32
    """
    B, D = latent.shape
    assert weight_row.shape == (1, D)
    assert bias.shape == (1,)

    if block_b is None:
        # ~8 MiB per latent buffer => <=16 MiB with double-buffering; safe on
        # v5e/v6e (128 MiB VMEM) and v7x (64 MiB physical, 32 MiB scoped).
        cap = max(8, (8 * 1024 * 1024) // (D * 4))
        cap = (cap // 8) * 8
        block_b = min(cap, max(8, ((B + 7) // 8) * 8))
    assert block_b % 8 == 0

    padded_b = pl.cdiv(B, block_b) * block_b
    if padded_b != B:
        latent = jnp.pad(latent, ((0, padded_b - B), (0, 0)))

    out = pl.pallas_call(
        _value_kernel,
        out_shape=jax.ShapeDtypeStruct((padded_b, 1), jnp.float32),
        grid_spec=pltpu.PrefetchScalarGridSpec(
            num_scalar_prefetch=0,
            grid=(padded_b // block_b,),
            in_specs=[
                pl.BlockSpec((block_b, D), lambda i: (i, 0)),        # latent tile
                pl.BlockSpec((1, D), lambda i: (0, 0)),              # weight, resident
                pl.BlockSpec(memory_space=pltpu.MemorySpace.SMEM),   # bias scalar
            ],
            out_specs=pl.BlockSpec((block_b, 1), lambda i: (i, 0)),
        ),
        compiler_params=pltpu.CompilerParams(
            dimension_semantics=("parallel",),
        ),
    )(latent, weight_row, bias)

    return out[:B]


def init_params(latent_dimension=256, seed=0):
    """Deterministic init mirroring the PyTorch module.

    fc1.weight: (1, D) orthogonal_(gain=1) -> a single unit-norm row.
    fc1.bias:   zeros.
    """
    key = jax.random.PRNGKey(seed)
    w = jax.random.normal(key, (1, latent_dimension), dtype=jnp.float32)
    w = w / jnp.linalg.norm(w)          # single row => unit norm == orthogonal
    b = jnp.zeros((1,), dtype=jnp.float32)
    return w, b


if __name__ == "__main__":
    latent_dimension = 256

    w, b = init_params(latent_dimension)
    key = jax.random.PRNGKey(0)
    k1, k2 = jax.random.split(key)

    # Small demo batch (typical module usage).
    latent_small = jax.random.normal(k1, (8, latent_dimension), dtype=jnp.float32)
    out_small = jax.block_until_ready(value_network(latent_small, w, b))
    ref_small = latent_small @ w.T + b
    np.testing.assert_allclose(np.asarray(out_small), np.asarray(ref_small),
                               rtol=1e-5, atol=1e-5)
    assert out_small.shape == (8, 1)

    # Ragged batch with an explicit small tile: exercises the multi-step grid,
    # final-tile padding, and the "parallel" batch axis.
    latent_big = jax.random.normal(k2, (200, latent_dimension), dtype=jnp.float32)
    out_big = jax.block_until_ready(value_network(latent_big, w, b, block_b=64))
    ref_big = latent_big @ w.T + b
    np.testing.assert_allclose(np.asarray(out_big), np.asarray(ref_big),
                               rtol=1e-5, atol=1e-5)
    assert out_big.shape == (200, 1)

    print("KERNEL_OK")
</pallas_src>

<mosaic_0001>
module attributes {stable_mosaic.version = 11 : i64} {
  func.func @_value_kernel(%arg0: i32, %arg1: memref<8x256xf32, #tpu.memory_space<vmem>>, %arg2: memref<1x256xf32, #tpu.memory_space<vmem>>, %arg3: memref<1xf32, #tpu.memory_space<smem>>, %arg4: memref<8x1xf32, #tpu.memory_space<vmem>>) attributes {dimension_semantics = [#tpu.dimension_semantics<parallel>], iteration_bounds = array<i64: 1>, scalar_prefetch = 0 : i64, scratch_operands = 0 : i64, tpu.core_type = #tpu.core_type<tc>, window_params = [{transform_indices = @transform_0, window_bounds = array<i64: 8, 256>}, {pipeline_mode = #tpu.pipeline_mode<synchronous>, transform_indices = @transform_1, window_bounds = array<i64: 1, 256>}, {transform_indices = @transform_2, window_bounds = array<i64: 1>}, {transform_indices = @transform_3, window_bounds = array<i64: 8, 1>}]} {
    %c0 = arith.constant 0 : index
    %c0_0 = arith.constant 0 : index
    %0 = vector.load %arg1[%c0, %c0_0] : memref<8x256xf32, #tpu.memory_space<vmem>>, vector<8x256xf32>
    %c0_1 = arith.constant 0 : index
    %c0_2 = arith.constant 0 : index
    %1 = vector.load %arg2[%c0_1, %c0_2] : memref<1x256xf32, #tpu.memory_space<vmem>>, vector<1x256xf32>
    %2 = vector.broadcast %1 : vector<1x256xf32> to vector<8x256xf32>
    %3 = arith.mulf %0, %2 : vector<8x256xf32>
    %cst = arith.constant dense<0.000000e+00> : vector<8xf32>
    %4 = vector.multi_reduction <add>, %3, %cst [1] : vector<8x256xf32> to vector<8xf32>
    %5 = vector.shape_cast %4 : vector<8xf32> to vector<8x1xf32>
    %c0_3 = arith.constant 0 : index
    %6 = memref.load %arg3[%c0_3] : memref<1xf32, #tpu.memory_space<smem>>
    %7 = vector.broadcast %6 : f32 to vector<8x1xf32>
    %8 = arith.addf %5, %7 : vector<8x1xf32>
    %c0_4 = arith.constant 0 : index
    %c0_5 = arith.constant 0 : index
    %9 = vector.load %arg4[%c0_4, %c0_5] : memref<8x1xf32, #tpu.memory_space<vmem>>, vector<8x1xf32>
    tpu.vector_store %arg4[%c0_4, %c0_5], %8 {strides = array<i32>} : memref<8x1xf32, #tpu.memory_space<vmem>>, vector<8x1xf32>,
    return
  }
  func.func @transform_0(%arg0: i32) -> (i32, i32) {
    %c0_i32 = arith.constant 0 : i32
    %c0_i32_0 = arith.constant 0 : i32
    return %arg0, %c0_i32 : i32, i32
  }
  func.func @transform_1(%arg0: i32) -> (i32, i32) {
    %c0_i32 = arith.constant 0 : i32
    %c0_i32_0 = arith.constant 0 : i32
    %c0_i32_1 = arith.constant 0 : i32
    return %c0_i32, %c0_i32_0 : i32, i32
  }
  func.func @transform_2(%arg0: i32) -> i32 {
    %c0_i32 = arith.constant 0 : i32
    %c0_i32_0 = arith.constant 0 : i32
    return %c0_i32 : i32
  }
  func.func @transform_3(%arg0: i32) -> (i32, i32) {
    %c0_i32 = arith.constant 0 : i32
    %c0_i32_0 = arith.constant 0 : i32
    return %arg0, %c0_i32 : i32, i32
  }
}

</mosaic_0001>

<bundles_post_ra>
// kernel: tpu_custom_call.1
= control target key start
LH: loop header
LB: loop body
LE: loop exit
PB: predicated region body
PF: predicated region fallthrough
CT: control target
= control target key end

     0   :  { %9 = vsyncpa [#allocation4], 0  ;;  %s79_s15 = smov [#allocation3]   ;;  %s112_s0 = inlined_call_operand.hbm [shape: f32[8,256], index: 0, kind: input, shape index: {}]   ;;  %s113_s1 = inlined_call_operand.vmem [shape: f32[1,256], index: 1, kind: input, shape index: {}]   ;;  %s114_s2 = inlined_call_operand.<no memory space> [shape: f32[1], index: 2, kind: input, shape index: {}]   ;;  %s115_s3 = inlined_call_operand.vmem [shape: f32[8,1], index: 3, kind: output, shape index: {}]  }
   0x1   :  { %s15_s14 = sshll.u32 %s112_s0, 4  ;;  %s17_s16 = sshll.u32 %s79_s15, 4  ;;  %s16_s14 = int_to_ptr.hbm [resolvable:$true] %s15_s14  ;;  %s18_s16 = int_to_ptr.vmem [resolvable:$true] %s17_s16 }
   0x2   :  { %20 = dma.hbm_to_vmem [thread:$0]  %s16_s14, 256, %s18_s16, [#allocation4]  }
   0x3   :  { %77 = dma.done.wait [#allocation4], 256  }
   0x4   :  { %78 = vsyncadd [#allocation4], 4294967040  ;;  %v29_v0 = vld [vmem:[#allocation3] sm:$0xff]  ;;  %v30_v1 = vld [vmem:[#allocation3 + $0x8] sm:$0xff]  ;;  %v43_v8 = vstv %s114_s2  ;;  %vm45_vm0 = vcmask 7168  }
   0x5   :  { %v31_v2 = vld [vmem:[%s113_s1] sm:$0x3] }
   0x6   :  { %v33_v3 = vperm.slane %v31_v2, 0  ;;  %v34_v4 = vperm.slane %v31_v2, 1 }
   0x8   :  { %v37_v5 = vmul.f32 %v33_v3, %v29_v0  ;;  %v38_v6 = vmul.f32 %v34_v4, %v30_v1 }
   0xa   :  { %v39_v7 = vadd.f32 %v38_v6, %v37_v5 }
   0xc   :  { %40 = vadd.xlane.f32.xlu0 %v39_v7 }
  0x7f   :  { %v41_v9 = vpop.xlane.xlu0 %40 }
  0x80   :  { %v44_v10 = vadd.f32 %v43_v8, %v41_v9 }
  0x82   :  { %46 = vst.msk [vmem:[%s115_s3] sm:$0xff] %vm45_vm0, %v44_v10 }
  0x83   :  { %51 = vsyncpa [#allocation4], 1 }

</bundles_post_ra>
